<compile_context>
chip_gen: v7x
topology: tpu7x:2x2x1
jax: 0.10.0
libtpu: 0.0.40
codegen_flags: <defaults>
</compile_context>

<pallas_src>
import functools

import jax
import jax.numpy as jnp
from jax import lax
from jax.experimental import pallas as pl
from jax.experimental.pallas import tpu as pltpu

LANES = 128            # lane width
SUBLANES = 8           # f32 sublane tile
MAX_BLOCK_ROWS = 4096  # (4096, 128) f32 = 2 MiB per operand per buffer


def _round_up(x, m):
    return (x + m - 1) // m * m


def _pick_chunk(block_rows):
    # Largest chunk in {32, 16, 8} that divides block_rows (block_rows % 8 == 0).
    for c in (32, 16, 8):
        if block_rows % c == 0:
            return c
    return 8


def _combined_loss_kernel(o_ref, m_ref, inter_ref, total_ref, bce_ref, *,
                          rows, block_rows, chunk, need_mask):
    i = pl.program_id(0)
    g = block_rows // chunk
    zero = jnp.zeros((chunk, LANES), jnp.float32)

    if need_mask:
        row_iota = lax.broadcasted_iota(jnp.int32, (chunk, LANES), 0)

    def body(j, carry):
        acc_i, acc_t, acc_b = carry
        r0 = pl.multiple_of(j * chunk, chunk)
        o = o_ref[pl.ds(r0, chunk), :].astype(jnp.float32)
        m = m_ref[pl.ds(r0, chunk), :].astype(jnp.float32)

        if need_mask:
            # Rows beyond `rows` (partial final block) hold garbage in VMEM.
            # Zero them: they then contribute exactly 0.5 (=sigmoid(0)) to the
            # "total" sum and 0 to intersection / BCE; the 0.5's are removed
            # in the wrapper epilogue with a static constant.
            valid = (i * block_rows + j * chunk + row_iota) < rows
            o = jnp.where(valid, o, 0.0)
            m = jnp.where(valid, m, 0.0)

        # sigmoid via a single EUP op (tanh) instead of exp + reciprocal.
        s = 0.5 * (jnp.tanh(0.5 * o) + 1.0)

        # nn.BCELoss elementwise term; logs clamped at -100 (PyTorch semantics).
        log_o = jnp.maximum(jnp.log(o), -100.0)
        log_1mo = jnp.maximum(jnp.log(1.0 - o), -100.0)
        bce = -(m * log_o + (1.0 - m) * log_1mo)

        return (acc_i + s * m, acc_t + (s + m), acc_b + bce)

    acc_i, acc_t, acc_b = lax.fori_loop(0, g, body, (zero, zero, zero))

    def fold8(x):
        # (chunk, 128) -> (8, 128) with static slices (pure VALU vreg adds).
        out = x[0:SUBLANES, :]
        for k in range(1, chunk // SUBLANES):
            out = out + x[k * SUBLANES:(k + 1) * SUBLANES, :]
        return out

    inter_ref[0] = fold8(acc_i)
    total_ref[0] = fold8(acc_t)
    bce_ref[0] = fold8(acc_b)


def combined_loss(outputs, masks, smooth=1.0, alpha=0.5):
    """Pallas implementation of CombinedLoss.forward (scalar result)."""
    assert outputs.shape == masks.shape
    n = int(outputs.size)

    o = outputs.reshape(-1)
    m = masks.reshape(-1)

    # Lay both operands out as lane-dense (rows, 128) slabs with rows % 8 == 0.
    # Only a ragged tail smaller than one (8, 128) tile is zero-padded here;
    # a partial final *block* is handled by the in-kernel row mask.
    tile = SUBLANES * LANES
    n_tile = _round_up(n, tile)
    if n_tile != n:
        o = jnp.pad(o, (0, n_tile - n))
        m = jnp.pad(m, (0, n_tile - n))
    rows = n_tile // LANES

    o2 = o.reshape(rows, LANES)
    m2 = m.reshape(rows, LANES)

    block_rows = min(MAX_BLOCK_ROWS, rows)           # multiple of 8 by construction
    grid_steps = pl.cdiv(rows, block_rows)
    covered = grid_steps * block_rows * LANES        # virtual elements seen by kernel
    pad_adjust = 0.5 * float(covered - n)            # sigmoid(0)=0.5 per padded elem
    need_mask = (rows % block_rows) != 0             # partial final block?
    chunk = _pick_chunk(block_rows)

    kernel = functools.partial(
        _combined_loss_kernel,
        rows=rows, block_rows=block_rows, chunk=chunk, need_mask=need_mask)

    part_shape = jax.ShapeDtypeStruct((grid_steps, SUBLANES, LANES), jnp.float32)
    part_spec = pl.BlockSpec((1, SUBLANES, LANES), lambda i: (i, 0, 0))

    inter_p, total_p, bce_p = pl.pallas_call(
        kernel,
        out_shape=(part_shape, part_shape, part_shape),
        grid=(grid_steps,),
        in_specs=[
            pl.BlockSpec((block_rows, LANES), lambda i: (i, 0)),
            pl.BlockSpec((block_rows, LANES), lambda i: (i, 0)),
        ],
        out_specs=(part_spec, part_spec, part_spec),
        compiler_params=pltpu.CompilerParams(
            dimension_semantics=("parallel",)),
    )(o2, m2)

    # TODO(synk): the O(1)/O(grid_steps) epilogue (tiny partial-sum reduce and
    # the scalar IoU/BCE mix) runs as plain XLA here; all O(n) work is in the
    # Pallas kernel above.
    s1 = jnp.sum(inter_p)                    # sum(sigmoid(o) * m)
    s2 = jnp.sum(total_p) - pad_adjust       # sum(sigmoid(o) + m)
    s3 = jnp.sum(bce_p)                      # sum of per-element BCE
    union = s2 - s1
    iou = (s1 + smooth) / (union + smooth)
    iou_loss = 1.0 - iou
    bce_mean = s3 / n
    return alpha * iou_loss + (1.0 - alpha) * bce_mean


def _reference_combined_loss(outputs, masks, smooth=1.0, alpha=0.5):
    o = outputs.astype(jnp.float32)
    m = masks.astype(jnp.float32)
    s = jax.nn.sigmoid(o)
    inter = jnp.sum(s * m)
    total = jnp.sum(s + m)
    union = total - inter
    iou = (inter + smooth) / (union + smooth)
    log_o = jnp.maximum(jnp.log(o), -100.0)
    log_1mo = jnp.maximum(jnp.log(1.0 - o), -100.0)
    bce = jnp.mean(-(m * log_o + (1.0 - m) * log_1mo))
    return alpha * (1.0 - iou) + (1.0 - alpha) * bce


if __name__ == "__main__":
    key = jax.random.PRNGKey(0)
    k_o, k_m = jax.random.split(key)

    # Segmentation-style inputs: NCHW with a single channel.
    B, C, H, W = 2, 1, 16, 16
    # BCELoss requires outputs in (0, 1): generate probabilities directly.
    outputs = jax.random.uniform(k_o, (B, C, H, W), jnp.float32,
                                 minval=0.01, maxval=0.99)
    masks = (jax.random.uniform(k_m, (B, C, H, W)) > 0.5).astype(jnp.float32)

    loss = combined_loss(outputs, masks, smooth=1.0, alpha=0.5)
    loss = jax.block_until_ready(loss)

    ref = _reference_combined_loss(outputs, masks, smooth=1.0, alpha=0.5)
    assert jnp.allclose(loss, ref, rtol=1e-5, atol=1e-5), (loss, ref)

    print("KERNEL_OK")
</pallas_src>

<mosaic_0001>
module attributes {stable_mosaic.version = 11 : i64} {
  func.func @_combined_loss_kernel(%arg0: i32, %arg1: memref<8x128xf32, #tpu.memory_space<vmem>>, %arg2: memref<8x128xf32, #tpu.memory_space<vmem>>, %arg3: memref<1x8x128xf32, #tpu.memory_space<vmem>>, %arg4: memref<1x8x128xf32, #tpu.memory_space<vmem>>, %arg5: memref<1x8x128xf32, #tpu.memory_space<vmem>>) attributes {dimension_semantics = [#tpu.dimension_semantics<parallel>], iteration_bounds = array<i64: 1>, scalar_prefetch = 0 : i64, scratch_operands = 0 : i64, tpu.core_type = #tpu.core_type<tc>, window_params = [{transform_indices = @transform_0, window_bounds = array<i64: 8, 128>}, {transform_indices = @transform_1, window_bounds = array<i64: 8, 128>}, {transform_indices = @transform_2, window_bounds = array<i64: 1, 8, 128>}, {transform_indices = @transform_3, window_bounds = array<i64: 1, 8, 128>}, {transform_indices = @transform_4, window_bounds = array<i64: 1, 8, 128>}]} {
    %cst = arith.constant 0.000000e+00 : f32
    %0 = vector.broadcast %cst : f32 to vector<8x128xf32>
    %c0_i32 = arith.constant 0 : i32
    %c8_i32 = arith.constant 8 : i32
    %1 = arith.muli %c0_i32, %c8_i32 : i32
    %2 = tpu.assume_multiple %1, 8 : i32
    %3 = arith.index_cast %2 : i32 to index
    %c0 = arith.constant 0 : index
    %4 = vector.load %arg1[%3, %c0] : memref<8x128xf32, #tpu.memory_space<vmem>>, vector<8x128xf32>
    %5 = arith.index_cast %2 : i32 to index
    %c0_0 = arith.constant 0 : index
    %6 = vector.load %arg2[%5, %c0_0] : memref<8x128xf32, #tpu.memory_space<vmem>>, vector<8x128xf32>
    %cst_1 = arith.constant 5.000000e-01 : f32
    %7 = vector.broadcast %cst_1 : f32 to vector<8x128xf32>
    %8 = arith.mulf %7, %4 : vector<8x128xf32>
    %9 = math.tanh %8 : vector<8x128xf32>
    %cst_2 = arith.constant 1.000000e+00 : f32
    %10 = vector.broadcast %cst_2 : f32 to vector<8x128xf32>
    %11 = arith.addf %9, %10 : vector<8x128xf32>
    %cst_3 = arith.constant 5.000000e-01 : f32
    %12 = vector.broadcast %cst_3 : f32 to vector<8x128xf32>
    %13 = arith.mulf %12, %11 : vector<8x128xf32>
    %14 = math.log %4 : vector<8x128xf32>
    %cst_4 = arith.constant -1.000000e+02 : f32
    %15 = vector.broadcast %cst_4 : f32 to vector<8x128xf32>
    %16 = arith.maximumf %14, %15 : vector<8x128xf32>
    %cst_5 = arith.constant 1.000000e+00 : f32
    %17 = vector.broadcast %cst_5 : f32 to vector<8x128xf32>
    %18 = arith.subf %17, %4 : vector<8x128xf32>
    %19 = math.log %18 : vector<8x128xf32>
    %cst_6 = arith.constant -1.000000e+02 : f32
    %20 = vector.broadcast %cst_6 : f32 to vector<8x128xf32>
    %21 = arith.maximumf %19, %20 : vector<8x128xf32>
    %22 = arith.mulf %6, %16 : vector<8x128xf32>
    %cst_7 = arith.constant 1.000000e+00 : f32
    %23 = vector.broadcast %cst_7 : f32 to vector<8x128xf32>
    %24 = arith.subf %23, %6 : vector<8x128xf32>
    %25 = arith.mulf %24, %21 : vector<8x128xf32>
    %26 = arith.addf %22, %25 : vector<8x128xf32>
    %cst_8 = arith.constant 0.000000e+00 : f32
    %27 = vector.broadcast %cst_8 : f32 to vector<8x128xf32>
    %28 = arith.subf %27, %26 : vector<8x128xf32>
    %29 = arith.mulf %13, %6 : vector<8x128xf32>
    %30 = arith.addf %0, %29 : vector<8x128xf32>
    %31 = arith.addf %13, %6 : vector<8x128xf32>
    %32 = arith.addf %0, %31 : vector<8x128xf32>
    %33 = arith.addf %0, %28 : vector<8x128xf32>
    %c1_i32 = arith.constant 1 : i32
    %c0_9 = arith.constant 0 : index
    %c0_10 = arith.constant 0 : index
    %c0_11 = arith.constant 0 : index
    %34 = vector.load %arg3[%c0_9, %c0_10, %c0_11] : memref<1x8x128xf32, #tpu.memory_space<vmem>>, vector<1x8x128xf32>
    %35 = vector.shape_cast %34 : vector<1x8x128xf32> to vector<8x128xf32>
    %36 = vector.shape_cast %30 : vector<8x128xf32> to vector<1x8x128xf32>
    tpu.vector_store %arg3[%c0_9, %c0_10, %c0_11], %36 {strides = array<i32>} : memref<1x8x128xf32, #tpu.memory_space<vmem>>, vector<1x8x128xf32>,
    %c0_12 = arith.constant 0 : index
    %c0_13 = arith.constant 0 : index
    %c0_14 = arith.constant 0 : index
    %37 = vector.load %arg4[%c0_12, %c0_13, %c0_14] : memref<1x8x128xf32, #tpu.memory_space<vmem>>, vector<1x8x128xf32>
    %38 = vector.shape_cast %37 : vector<1x8x128xf32> to vector<8x128xf32>
    %39 = vector.shape_cast %32 : vector<8x128xf32> to vector<1x8x128xf32>
    tpu.vector_store %arg4[%c0_12, %c0_13, %c0_14], %39 {strides = array<i32>} : memref<1x8x128xf32, #tpu.memory_space<vmem>>, vector<1x8x128xf32>,
    %c0_15 = arith.constant 0 : index
    %c0_16 = arith.constant 0 : index
    %c0_17 = arith.constant 0 : index
    %40 = vector.load %arg5[%c0_15, %c0_16, %c0_17] : memref<1x8x128xf32, #tpu.memory_space<vmem>>, vector<1x8x128xf32>
    %41 = vector.shape_cast %40 : vector<1x8x128xf32> to vector<8x128xf32>
    %42 = vector.shape_cast %33 : vector<8x128xf32> to vector<1x8x128xf32>
    tpu.vector_store %arg5[%c0_15, %c0_16, %c0_17], %42 {strides = array<i32>} : memref<1x8x128xf32, #tpu.memory_space<vmem>>, vector<1x8x128xf32>,
    return
  }
  func.func @transform_0(%arg0: i32) -> (i32, i32) {
    %c0_i32 = arith.constant 0 : i32
    %c0_i32_0 = arith.constant 0 : i32
    return %arg0, %c0_i32 : i32, i32
  }
  func.func @transform_1(%arg0: i32) -> (i32, i32) {
    %c0_i32 = arith.constant 0 : i32
    %c0_i32_0 = arith.constant 0 : i32
    return %arg0, %c0_i32 : i32, i32
  }
  func.func @transform_2(%arg0: i32) -> (i32, i32, i32) {
    %c0_i32 = arith.constant 0 : i32
    %c0_i32_0 = arith.constant 0 : i32
    %c0_i32_1 = arith.constant 0 : i32
    return %arg0, %c0_i32, %c0_i32_0 : i32, i32, i32
  }
  func.func @transform_3(%arg0: i32) -> (i32, i32, i32) {
    %c0_i32 = arith.constant 0 : i32
    %c0_i32_0 = arith.constant 0 : i32
    %c0_i32_1 = arith.constant 0 : i32
    return %arg0, %c0_i32, %c0_i32_0 : i32, i32, i32
  }
  func.func @transform_4(%arg0: i32) -> (i32, i32, i32) {
    %c0_i32 = arith.constant 0 : i32
    %c0_i32_0 = arith.constant 0 : i32
    %c0_i32_1 = arith.constant 0 : i32
    return %arg0, %c0_i32, %c0_i32_0 : i32, i32, i32
  }
}

</mosaic_0001>

<bundles_post_ra>
// kernel: tpu_custom_call.1
= control target key start
LH: loop header
LB: loop body
LE: loop exit
PB: predicated region body
PF: predicated region fallthrough
CT: control target
= control target key end

     0   :  { %10 = vsyncpa [#allocation3], 0  ;;  %s335_s0 = inlined_call_operand.hbm [shape: f32[8,128], index: 0, kind: input, shape index: {}]   ;;  %s336_s1 = inlined_call_operand.hbm [shape: f32[8,128], index: 1, kind: input, shape index: {}]   ;;  %s337_s2 = inlined_call_operand.hbm [shape: f32[1,8,128], index: 2, kind: output, shape index: {0}]   ;;  %s338_s3 = inlined_call_operand.hbm [shape: f32[1,8,128], index: 3, kind: output, shape index: {1}]   ;;  %s339_s4 = inlined_call_operand.hbm [shape: f32[1,8,128], index: 4, kind: output, shape index: {2}]  }
   0x1   :  { %11 = vsyncpa [#allocation6], 0 }
   0x2   :  { %12 = vsyncpa [#allocation4], 0 }
   0x3   :  { %13 = vsyncpa [#allocation9], 0  ;;  %s238_s15 = smov [#allocation2]   ;;  %s239_s17 = smov [#allocation5]  }
   0x4   :  { %s20_s16 = sshll.u32 %s238_s15, 4  ;;  %s30_s18 = sshll.u32 %s239_s17, 4  ;;  %s21_s16 = int_to_ptr.vmem [resolvable:$true] %s20_s16  ;;  %s31_s18 = int_to_ptr.vmem [resolvable:$true] %s30_s18 }
   0x5   :  { %s120_s21 = scalar_lea.hbm %s335_s0, 128 }
   0x6   :  { %p121_p0 = scmp.ne.s32.totalorder %s335_s0, %s120_s21  ;;  %p124_p1 = scmp.lt.u32.totalorder %s120_s21, %s335_s0 }
   0x8   :  { %p126_p2 = pnand %p124_p1, %p121_p0 }
   0xa   :  { %129 = shalt.err (!%p126_p2)
}
   0xb   :  { %s130_s26 = scalar_lea.vmem %s21_s16, 128  ;;  %p135_p4 = scmp.lt.s32.totalorder %s21_s16, %s21_s16 }
   0xc   :  { %p131_p3 = scmp.ne.s32.totalorder %s21_s16, %s130_s26  ;;  %p136_p5 = scmp.lt.s32.totalorder %s130_s26, %s130_s26 }
   0xe   :  { %p137_p6 = por %p136_p5, %p135_p4 }
  0x10   :  { %p138_p7 = pnand %p137_p6, %p131_p3 }
  0x12   :  { %141 = shalt.err (!%p138_p7)
}
  0x13   :  { %23 = dma.hbm_to_vmem [thread:$0]  %s335_s0, 128, %s21_s16, [#allocation3]  }
  0x14   :  { %s142_s5 = scalar_lea.hbm %s336_s1, 128 }
  0x15   :  { %p143_p8 = scmp.ne.s32.totalorder %s336_s1, %s142_s5  ;;  %p146_p9 = scmp.lt.u32.totalorder %s142_s5, %s336_s1 }
  0x17   :  { %p148_p10 = pnand %p146_p9, %p143_p8 }
  0x19   :  { %151 = shalt.err (!%p148_p10)
}
  0x1a   :  { %s152_s10 = scalar_lea.vmem %s31_s18, 128  ;;  %p157_p12 = scmp.lt.s32.totalorder %s31_s18, %s31_s18 }
  0x1b   :  { %p153_p11 = scmp.ne.s32.totalorder %s31_s18, %s152_s10  ;;  %p158_p13 = scmp.lt.s32.totalorder %s152_s10, %s152_s10 }
  0x1d   :  { %p159_p0 = por %p158_p13, %p157_p12 }
  0x1f   :  { %p160_p1 = pnand %p159_p0, %p153_p11 }
  0x21   :  { %163 = shalt.err (!%p160_p1)
}
  0x22   :  { %33 = dma.hbm_to_vmem [thread:$0]  %s336_s1, 128, %s31_s18, [#allocation6]  }
  0x23   :  { %230 = dma.done.wait [#allocation3], 128  }
  0x24   :  { %231 = vsyncadd [#allocation3], 4294967168 }
  0x25   :  { %232 = dma.done.wait [#allocation6], 128  }
  0x26   :  { %233 = vsyncadd [#allocation6], 4294967168  ;;  %v40_v0 = vld [vmem:[#allocation2] sm:$0xff]  ;;  %v41_v4 = vld [vmem:[#allocation5] sm:$0xff]  ;;  %s240_s1 = smov [#allocation8]   ;;  %s241_s13 = smov [#allocation7]  }
  0x27   :  { %v42_v1 = vmul.f32 0.5, %v40_v0  ;;  %114 = vlog2.f32 %v40_v0  ;;  %v49_v2 = vsub.f32 1.0, %v40_v0  ;;  %v54_v11 = vsub.f32 1.0, %v41_v4  ;;  %s82_s12 = sshll.u32 %s240_s1, 4  ;;  %s72_s14 = sshll.u32 %s241_s13, 4  ;;  %s83_s12 = int_to_ptr.vmem [resolvable:$true] %s82_s12  ;;  %s292_s14 = int_to_ptr.vmem [resolvable:$true] %s72_s14 }
  0x28   :  { %s242_s15 = smov [#allocation10]   ;;  %s164_s17 = scalar_lea.vmem %s83_s12, 128 }
  0x29   :  { %116 = vtanh.f32 %v42_v1  ;;  %s92_s16 = sshll.u32 %s242_s15, 4  ;;  %p165_p2 = scmp.ne.s32.totalorder %s83_s12, %s164_s17  ;;  %s93_s16 = int_to_ptr.vmem [resolvable:$true] %s92_s16 }
  0x2a   :  { %118 = vlog2.f32 %v49_v2  ;;  %p169_p3 = scmp.lt.s32.totalorder %s83_s12, %s83_s12  ;;  %p170_p4 = scmp.lt.s32.totalorder %s164_s17, %s164_s17 }
  0x2c   :  { %p171_p5 = por %p170_p4, %p169_p3 }
  0x2e   :  { %p172_p6 = pnand %p171_p5, %p165_p2 }
  0x31   :  { %v115_v3 = vpop.eup %114 }
  0x32   :  { %v47_v5 = vmul.f32 0.6931472, %v115_v3 }
  0x33   :  { %v117_v6 = vpop.eup %116 }
  0x34   :  { %v119_v7 = vpop.eup %118  ;;  %v44_v8 = vadd.f32 1.0, %v117_v6  ;;  %v48_v9 = vmax.f32 %v47_v5, -100.0 }
  0x35   :  { %v51_v10 = vmul.f32 0.6931472, %v119_v7 }
  0x36   :  { %v45_v12 = vmul.f32 0.5, %v44_v8  ;;  %v53_v14 = vmul.f32 %v48_v9, %v41_v4 }
  0x37   :  { %v52_v13 = vmax.f32 %v51_v10, -100.0 }
  0x38   :  { %v60_v15 = vadd.f32 %v45_v12, %v41_v4  ;;  %v58_v16 = vmul.f32 %v45_v12, %v41_v4 }
  0x39   :  { %v55_v17 = vmul.f32 %v54_v11, %v52_v13 }
  0x3a   :  { %64 = vst [vmem:[#allocation8] sm:$0xff] %v60_v15  ;;  %63 = vst [vmem:[#allocation7] sm:$0xff] %v58_v16 }
  0x3b   :  { %v56_v18 = vadd.f32 %v55_v17, %v53_v14 }
  0x3c   :  { %175 = shalt.err (!%p172_p6)
}
  0x3d   :  { %s176_s20 = scalar_lea.hbm %s338_s3, 128 }
  0x3e   :  { %p177_p7 = scmp.ne.s32.totalorder %s338_s3, %s176_s20  ;;  %p180_p8 = scmp.lt.u32.totalorder %s176_s20, %s338_s3 }
  0x40   :  { %p182_p9 = pnand %p180_p8, %p177_p7 }
  0x42   :  { %185 = shalt.err (!%p182_p9)
}
  0x43   :  { %85 = dma.vmem_to_hbm [thread:$0]  %s83_s12, 128, %s338_s3, [#allocation9]  }
  0x44   :  { %s186_s27 = scalar_lea.vmem %s292_s14, 128  ;;  %p191_p11 = scmp.lt.s32.totalorder %s292_s14, %s292_s14 }
  0x45   :  { %p187_p10 = scmp.ne.s32.totalorder %s292_s14, %s186_s27  ;;  %p192_p12 = scmp.lt.s32.totalorder %s186_s27, %s186_s27 }
  0x47   :  { %p193_p13 = por %p192_p12, %p191_p11 }
  0x49   :  { %p194_p0 = pnand %p193_p13, %p187_p10 }
  0x4b   :  { %197 = shalt.err (!%p194_p0)
}
  0x4c   :  { %s198_s30 = scalar_lea.hbm %s337_s2, 128 }
  0x4d   :  { %p199_p1 = scmp.ne.s32.totalorder %s337_s2, %s198_s30  ;;  %p202_p2 = scmp.lt.u32.totalorder %s198_s30, %s337_s2 }
  0x4f   :  { %p204_p3 = pnand %p202_p2, %p199_p1 }
  0x51   :  { %207 = shalt.err (!%p204_p3)
}
  0x52   :  { %75 = dma.vmem_to_hbm [thread:$0]  %s292_s14, 128, %s337_s2, [#allocation4]   ;;  %v57_v19 = vsub.f32 0.0, %v56_v18 }
  0x53   :  { %s208_s10 = scalar_lea.vmem %s93_s16, 128  ;;  %p213_p5 = scmp.lt.s32.totalorder %s93_s16, %s93_s16 }
  0x54   :  { %65 = vst [vmem:[#allocation10] sm:$0xff] %v57_v19  ;;  %p209_p4 = scmp.ne.s32.totalorder %s93_s16, %s208_s10  ;;  %p214_p6 = scmp.lt.s32.totalorder %s208_s10, %s208_s10 }
  0x56   :  { %p215_p7 = por %p214_p6, %p213_p5 }
  0x58   :  { %p216_p8 = pnand %p215_p7, %p209_p4 }
  0x5a   :  { %219 = shalt.err (!%p216_p8)
}
  0x5b   :  { %s220_s1 = scalar_lea.hbm %s339_s4, 128 }
  0x5c   :  { %p221_p9 = scmp.ne.s32.totalorder %s339_s4, %s220_s1  ;;  %p224_p10 = scmp.lt.u32.totalorder %s220_s1, %s339_s4 }
  0x5e   :  { %p226_p11 = pnand %p224_p10, %p221_p9 }
  0x60   :  { %229 = shalt.err (!%p226_p11)
}
  0x61   :  { %95 = dma.vmem_to_hbm [thread:$0]  %s93_s16, 128, %s339_s4, [#allocation9]  }
  0x62   :  { %234 = dma.done.wait [#allocation4], 128  }
  0x63   :  { %235 = vsyncadd [#allocation4], 4294967168 }
  0x64   :  { %236 = dma.done.wait [#allocation9], 256  }
  0x65   :  { %237 = vsyncadd [#allocation9], 4294967040 }
  0x66   :  { %105 = vsyncpa [#allocation3], 1 }
  0x67   :  { %106 = vsyncpa [#allocation6], 1 }
  0x68   :  { %107 = vsyncpa [#allocation4], 1 }
  0x69   :  { %108 = vsyncpa [#allocation9], 1 }

</bundles_post_ra>
